<compile_context>
chip_gen: v7x
topology: tpu7x:2x2x1
jax: 0.10.0
libtpu: 0.0.40
codegen_flags: <defaults>
</compile_context>

<pallas_src>
import functools

import jax
import jax.numpy as jnp
from jax.experimental import pallas as pl
from jax.experimental.pallas import tpu as pltpu


_NEG_PAD = -1e30  # lane-padding value: exp(-1e30 - max) == 0, so padded columns are inert


def _round_up(x, m):
    return ((x + m - 1) // m) * m


# ---------------------------------------------------------------------------
# Kernel bodies
# ---------------------------------------------------------------------------

def _gather_rows(idx_ref, emb_ref, dst_ref, base, tm):
    """dst_ref[t, :] = emb_ref[idx[base + t], :] for t in [0, tm). Exact gather, no MXU."""
    def body(t, carry):
        tok = idx_ref[base + t]                       # dynamic SMEM scalar read
        dst_ref[pl.ds(t, 1), :] = emb_ref[pl.ds(tok, 1), :]   # dynamic sublane copy
        return carry
    jax.lax.fori_loop(0, tm, body, 0)


def _tile_xent_partial(rows_f32, tgt_col, base, n_valid, tm, vp):
    """Sum of per-token log-softmax cross-entropy over one tile (padded rows -> 0)."""
    col = jax.lax.broadcasted_iota(jnp.int32, (tm, vp), 1)
    m = jnp.max(rows_f32, axis=-1, keepdims=True)                           # (tm, 1)
    lse = m + jnp.log(jnp.sum(jnp.exp(rows_f32 - m), axis=-1, keepdims=True))
    tgt_logit = jnp.sum(jnp.where(col == tgt_col, rows_f32, 0.0),
                        axis=-1, keepdims=True)                             # (tm, 1)
    nll = lse - tgt_logit
    row_id = base + jax.lax.broadcasted_iota(jnp.int32, (tm, 1), 0)
    nll = jnp.where(row_id < n_valid, nll, 0.0)       # mask padded tokens
    return jnp.sum(nll, keepdims=True)                # (1, 1) per-tile partial


def _logits_loss_kernel(nvalid_ref, idx_ref, tgt_ref, emb_ref,
                        logits_ref, loss_ref, *, tm, vp):
    base = pl.program_id(0) * tm
    _gather_rows(idx_ref, emb_ref, logits_ref, base, tm)      # lane-dense (tm, vp) block
    rows = logits_ref[...].astype(jnp.float32)
    loss_ref[...] = _tile_xent_partial(rows, tgt_ref[...], base, nvalid_ref[0], tm, vp)


def _logits_only_kernel(idx_ref, emb_ref, logits_ref, *, tm):
    base = pl.program_id(0) * tm
    _gather_rows(idx_ref, emb_ref, logits_ref, base, tm)


def _loss_only_kernel(nvalid_ref, idx_ref, tgt_ref, emb_ref,
                      loss_ref, rows_ref, *, tm, vp):
    base = pl.program_id(0) * tm
    _gather_rows(idx_ref, emb_ref, rows_ref, base, tm)        # gather into VMEM scratch
    rows = rows_ref[...].astype(jnp.float32)
    loss_ref[...] = _tile_xent_partial(rows, tgt_ref[...], base, nvalid_ref[0], tm, vp)


# ---------------------------------------------------------------------------
# Wrapper
# ---------------------------------------------------------------------------

def _vmem_ceiling_bytes():
    """Generation-aware VMEM ceiling with ~8 MiB headroom for Mosaic internals."""
    try:
        cap = int(pltpu.get_tpu_info().vmem_capacity_bytes)
    except Exception:
        cap = 64 << 20            # conservative (v7x per-TC); safe on every generation
    return max(min(cap - (8 << 20), 110 << 20), 16 << 20)


def _pick_tm(n_tokens, vp, itemsize, table_bytes, vmem_ceiling):
    """Largest tokens-per-tile in {512, 256, 128} that fits VMEM; small N -> round_up(N,8)."""
    n8 = _round_up(max(n_tokens, 1), 8)
    budget = vmem_ceiling - table_bytes - (4 << 20)
    for tm in (512, 256, 128):
        # 2x logits (double-buffered output) + 1x gather scratch, conservatively.
        if tm <= n8 and 3 * tm * vp * itemsize <= budget:
            return tm
    return min(n8, 128)


def _forward_impl(emb_table, index, target, return_logits, single_buffer):
    B, T = index.shape
    V = emb_table.shape[1]
    N = B * T
    itemsize = emb_table.dtype.itemsize

    # Lane padding of the vocab axis (review item 9).
    Vp = _round_up(V, 128)
    emb_p = emb_table if Vp == V else jnp.pad(
        emb_table, ((0, 0), (0, Vp - V)), constant_values=_NEG_PAD)

    vmem_ceiling = _vmem_ceiling_bytes()
    table_bytes = V * Vp * itemsize
    TM = _pick_tm(N, Vp, itemsize, table_bytes, vmem_ceiling)
    Np = _round_up(N, TM)
    G = Np // TM

    idx_flat = jnp.pad(index.reshape(N).astype(jnp.int32), (0, Np - N))
    nvalid = jnp.array([N], dtype=jnp.int32)          # SMEM scalar, not a baked constant

    needed = (table_bytes * (1 if single_buffer else 2)
              + 4 * TM * Vp * itemsize + (2 << 20))
    vmem_limit = int(min(vmem_ceiling, max(needed, 32 << 20)))

    cparams = pltpu.CompilerParams(
        dimension_semantics=("parallel",),            # no cross-step accumulators
        vmem_limit_bytes=vmem_limit)

    def table_spec(n_prefetch):
        imap = (lambda i, ix: (0, 0)) if n_prefetch == 1 else (lambda i, nv, ix: (0, 0))
        if single_buffer:
            # Constant index_map -> never re-fetched; drop the wasted second buffer.
            return pl.BlockSpec((V, Vp), imap, pipeline_mode=pl.Buffered(buffer_count=1))
        return pl.BlockSpec((V, Vp), imap)

    if target is None:
        logits_pad = pl.pallas_call(
            functools.partial(_logits_only_kernel, tm=TM),
            out_shape=jax.ShapeDtypeStruct((Np, Vp), emb_table.dtype),
            grid_spec=pltpu.PrefetchScalarGridSpec(
                num_scalar_prefetch=1,
                grid=(G,),
                in_specs=[table_spec(1)],
                out_specs=pl.BlockSpec((TM, Vp), lambda i, ix: (i, 0)),
            ),
            compiler_params=cparams,
        )(idx_flat, emb_p)
        return logits_pad[:N, :V].reshape(B, T, V), None

    tgt_col = jnp.pad(target.reshape(N).astype(jnp.int32), (0, Np - N)).reshape(Np, 1)
    tgt_spec = pl.BlockSpec((TM, 1), lambda i, nv, ix: (i, 0))
    loss_spec = pl.BlockSpec((1, 1), lambda i, nv, ix: (i, 0))   # per-tile partial sums

    if return_logits:
        logits_pad, partials = pl.pallas_call(
            functools.partial(_logits_loss_kernel, tm=TM, vp=Vp),
            out_shape=(jax.ShapeDtypeStruct((Np, Vp), emb_table.dtype),
                       jax.ShapeDtypeStruct((G, 1), jnp.float32)),
            grid_spec=pltpu.PrefetchScalarGridSpec(
                num_scalar_prefetch=2,
                grid=(G,),
                in_specs=[tgt_spec, table_spec(2)],
                out_specs=(pl.BlockSpec((TM, Vp), lambda i, nv, ix: (i, 0)), loss_spec),
            ),
            compiler_params=cparams,
        )(nvalid, idx_flat, tgt_col, emb_p)
        loss = jnp.sum(partials) / N
        return logits_pad[:N, :V].reshape(B, T, V), loss

    # Loss-only fast path: never writes the (N, V) logits to HBM (review item 8).
    partials = pl.pallas_call(
        functools.partial(_loss_only_kernel, tm=TM, vp=Vp),
        out_shape=jax.ShapeDtypeStruct((G, 1), jnp.float32),
        grid_spec=pltpu.PrefetchScalarGridSpec(
            num_scalar_prefetch=2,
            grid=(G,),
            in_specs=[tgt_spec, table_spec(2)],
            out_specs=loss_spec,
            scratch_shapes=[pltpu.VMEM((TM, Vp), emb_table.dtype)],
        ),
        compiler_params=cparams,
    )(nvalid, idx_flat, tgt_col, emb_p)
    return None, jnp.sum(partials) / N


_single_buffer_table = True   # flipped off once if this jax build rejects pl.Buffered(1)


def chicken_simple_forward(emb_table, index, target=None, return_logits=True):
    """Mirrors ChickenSimple.forward: returns (logits, loss).

    return_logits=False (with a target) is a loss-only fast path that skips
    materializing the (N, V) logits in HBM.
    """
    global _single_buffer_table
    if _single_buffer_table:
        try:
            return _forward_impl(emb_table, index, target, return_logits, True)
        except Exception:
            _single_buffer_table = False     # fall back to a double-buffered table spec
    return _forward_impl(emb_table, index, target, return_logits, False)


# TODO(synk): generate() uses torch.multinomial sampling in a host-side Python loop; the
# per-step forward is covered by the kernels above, sampling glue is left to JAX.


def _reference_forward(emb_table, index, target):
    logits = emb_table[index]                        # (B, T, V)
    if target is None:
        return logits, None
    B, T, V = logits.shape
    lflat = logits.reshape(B * T, V)
    logp = jax.nn.log_softmax(lflat, axis=-1)
    nll = -logp[jnp.arange(B * T), target.reshape(B * T)]
    return logits, jnp.mean(nll)


if __name__ == "__main__":
    vocab_size = 128
    B, T = 2, 8

    key = jax.random.PRNGKey(0)
    k_emb, k_idx, k_tgt = jax.random.split(key, 3)

    # nn.Embedding default init: N(0, 1)
    emb_table = jax.random.normal(k_emb, (vocab_size, vocab_size), dtype=jnp.float32)
    index = jax.random.randint(k_idx, (B, T), 0, vocab_size, dtype=jnp.int32)
    target = jax.random.randint(k_tgt, (B, T), 0, vocab_size, dtype=jnp.int32)

    # 1) logits + loss
    logits, loss = chicken_simple_forward(emb_table, index, target)
    logits = jax.block_until_ready(logits)
    loss = jax.block_until_ready(loss)
    ref_logits, ref_loss = _reference_forward(emb_table, index, target)
    assert logits.shape == (B, T, vocab_size)
    assert jnp.allclose(logits, ref_logits, atol=1e-5, rtol=1e-5)
    assert jnp.allclose(loss, ref_loss, atol=1e-5, rtol=1e-5)

    # 2) target=None path (loss is None)
    logits_only, none_loss = chicken_simple_forward(emb_table, index, None)
    jax.block_until_ready(logits_only)
    assert none_loss is None
    assert jnp.allclose(logits_only, ref_logits, atol=1e-5, rtol=1e-5)

    # 3) loss-only fast path (no logits HBM write)
    no_logits, fast_loss = chicken_simple_forward(emb_table, index, target,
                                                  return_logits=False)
    jax.block_until_ready(fast_loss)
    assert no_logits is None
    assert jnp.allclose(fast_loss, ref_loss, atol=1e-5, rtol=1e-5)

    # 4) vocab not a multiple of 128 exercises the lane-padding path
    v2, B2, T2 = 100, 2, 4
    k_emb2, k_idx2, k_tgt2 = jax.random.split(jax.random.PRNGKey(1), 3)
    emb2 = jax.random.normal(k_emb2, (v2, v2), dtype=jnp.float32)
    idx2 = jax.random.randint(k_idx2, (B2, T2), 0, v2, dtype=jnp.int32)
    tgt2 = jax.random.randint(k_tgt2, (B2, T2), 0, v2, dtype=jnp.int32)
    lg2, ls2 = chicken_simple_forward(emb2, idx2, tgt2)
    jax.block_until_ready(lg2)
    rlg2, rls2 = _reference_forward(emb2, idx2, tgt2)
    assert lg2.shape == (B2, T2, v2)
    assert jnp.allclose(lg2, rlg2, atol=1e-5, rtol=1e-5)
    assert jnp.allclose(ls2, rls2, atol=1e-5, rtol=1e-5)

    print("KERNEL_OK")
</pallas_src>

<mosaic_0001>
module attributes {stable_mosaic.version = 11 : i64} {
  func.func @_logits_loss_kernel(%arg0: i32, %arg1: memref<1xi32, #tpu.memory_space<smem>>, %arg2: memref<16xi32, #tpu.memory_space<smem>>, %arg3: memref<16x1xi32, #tpu.memory_space<vmem>>, %arg4: memref<128x128xf32, #tpu.memory_space<vmem>>, %arg5: memref<16x128xf32, #tpu.memory_space<vmem>>, %arg6: memref<1x1xf32, #tpu.memory_space<vmem>>) attributes {dimension_semantics = [#tpu.dimension_semantics<parallel>], iteration_bounds = array<i64: 1>, scalar_prefetch = 2 : i64, scratch_operands = 0 : i64, tpu.core_type = #tpu.core_type<tc>, window_params = [{transform_indices = @transform_0, window_bounds = array<i64: 16, 1>}, {pipeline_mode = #tpu.pipeline_mode<synchronous>, transform_indices = @transform_1, window_bounds = array<i64: 128, 128>}, {transform_indices = @transform_2, window_bounds = array<i64: 16, 128>}, {transform_indices = @transform_3, window_bounds = array<i64: 1, 1>}]} {
    %c16_i32 = arith.constant 16 : i32
    %0 = arith.muli %arg0, %c16_i32 : i32
    %c0_i32 = arith.constant 0 : i32
    %c16_i32_0 = arith.constant 16 : i32
    %1 = arith.addi %c0_i32, %c16_i32_0 : i32
    %c1_i32 = arith.constant 1 : i32
    scf.for %arg7 = %c0_i32 to %1 step %c1_i32  : i32 {
      %35 = arith.addi %0, %arg7 : i32
      %36 = arith.index_cast %35 : i32 to index
      %37 = memref.load %arg2[%36] : memref<16xi32, #tpu.memory_space<smem>>
      %38 = arith.index_cast %37 : i32 to index
      %c0_13 = arith.constant 0 : index
      %39 = vector.load %arg4[%38, %c0_13] : memref<128x128xf32, #tpu.memory_space<vmem>>, vector<1x128xf32>
      %40 = arith.index_cast %arg7 : i32 to index
      %c0_14 = arith.constant 0 : index
      %41 = vector.load %arg5[%40, %c0_14] : memref<16x128xf32, #tpu.memory_space<vmem>>, vector<1x128xf32>
      tpu.vector_store %arg5[%40, %c0_14], %39 {strides = array<i32>} : memref<16x128xf32, #tpu.memory_space<vmem>>, vector<1x128xf32>,
    }
    %c16_i32_1 = arith.constant 16 : i32
    %c0 = arith.constant 0 : index
    %c0_2 = arith.constant 0 : index
    %2 = vector.load %arg5[%c0, %c0_2] : memref<16x128xf32, #tpu.memory_space<vmem>>, vector<16x128xf32>
    %c0_3 = arith.constant 0 : index
    %c0_4 = arith.constant 0 : index
    %3 = vector.load %arg3[%c0_3, %c0_4] : memref<16x1xi32, #tpu.memory_space<vmem>>, vector<16x1xi32>
    %c0_5 = arith.constant 0 : index
    %4 = memref.load %arg1[%c0_5] : memref<1xi32, #tpu.memory_space<smem>>
    %5 = tpu.iota {dimensions = array<i32: 1>} : vector<16x128xi32>
    %cst = arith.constant dense<0xFF800000> : vector<16xf32>
    %6 = vector.multi_reduction <maximumf>, %2, %cst [1] : vector<16x128xf32> to vector<16xf32>
    %7 = vector.shape_cast %6 : vector<16xf32> to vector<16x1xf32>
    %8 = vector.broadcast %7 : vector<16x1xf32> to vector<16x128xf32>
    %9 = arith.subf %2, %8 : vector<16x128xf32>
    %10 = math.exp %9 : vector<16x128xf32>
    %cst_6 = arith.constant dense<0.000000e+00> : vector<16xf32>
    %11 = vector.multi_reduction <add>, %10, %cst_6 [1] : vector<16x128xf32> to vector<16xf32>
    %12 = vector.shape_cast %11 : vector<16xf32> to vector<16x1xf32>
    %13 = math.log %12 : vector<16x1xf32>
    %14 = arith.addf %7, %13 : vector<16x1xf32>
    %15 = vector.broadcast %3 : vector<16x1xi32> to vector<16x128xi32>
    %16 = arith.cmpi eq, %5, %15 : vector<16x128xi32>
    %cst_7 = arith.constant 0.000000e+00 : f32
    %17 = vector.broadcast %cst_7 : f32 to vector<16x128xf32>
    %18 = arith.select %16, %2, %17 : vector<16x128xi1>, vector<16x128xf32>
    %cst_8 = arith.constant dense<0.000000e+00> : vector<16xf32>
    %19 = vector.multi_reduction <add>, %18, %cst_8 [1] : vector<16x128xf32> to vector<16xf32>
    %20 = vector.shape_cast %19 : vector<16xf32> to vector<16x1xf32>
    %21 = arith.subf %14, %20 : vector<16x1xf32>
    %22 = tpu.iota {dimensions = array<i32: 0>} : vector<16x1xi32>
    %23 = vector.broadcast %0 : i32 to vector<16x1xi32>
    %24 = arith.addi %23, %22 : vector<16x1xi32>
    %25 = vector.broadcast %4 : i32 to vector<16x1xi32>
    %26 = arith.cmpi slt, %24, %25 : vector<16x1xi32>
    %cst_9 = arith.constant 0.000000e+00 : f32
    %27 = vector.broadcast %cst_9 : f32 to vector<16x1xf32>
    %28 = arith.select %26, %21, %27 : vector<16x1xi1>, vector<16x1xf32>
    %29 = vector.shape_cast %28 : vector<16x1xf32> to vector<1x16x1xf32>
    %cst_10 = arith.constant dense<0.000000e+00> : vector<1xf32>
    %30 = vector.multi_reduction <add>, %29, %cst_10 [1, 2] : vector<1x16x1xf32> to vector<1xf32>
    %31 = vector.shape_cast %30 : vector<1xf32> to vector<1x1x1xf32>
    %32 = vector.extract %31[0, 0, 0] : f32 from vector<1x1x1xf32>
    %33 = vector.broadcast %32 : f32 to vector<1x1xf32>
    %c0_11 = arith.constant 0 : index
    %c0_12 = arith.constant 0 : index
    %34 = vector.load %arg6[%c0_11, %c0_12] : memref<1x1xf32, #tpu.memory_space<vmem>>, vector<1x1xf32>
    tpu.vector_store %arg6[%c0_11, %c0_12], %33 {strides = array<i32>} : memref<1x1xf32, #tpu.memory_space<vmem>>, vector<1x1xf32>,
    return
  }
  func.func @transform_0(%arg0: i32, %arg1: memref<1xi32, #tpu.memory_space<smem>>, %arg2: memref<16xi32, #tpu.memory_space<smem>>) -> (i32, i32) {
    %c0_i32 = arith.constant 0 : i32
    %c0_i32_0 = arith.constant 0 : i32
    return %arg0, %c0_i32 : i32, i32
  }
  func.func @transform_1(%arg0: i32, %arg1: memref<1xi32, #tpu.memory_space<smem>>, %arg2: memref<16xi32, #tpu.memory_space<smem>>) -> (i32, i32) {
    %c0_i32 = arith.constant 0 : i32
    %c0_i32_0 = arith.constant 0 : i32
    %c0_i32_1 = arith.constant 0 : i32
    return %c0_i32, %c0_i32_0 : i32, i32
  }
  func.func @transform_2(%arg0: i32, %arg1: memref<1xi32, #tpu.memory_space<smem>>, %arg2: memref<16xi32, #tpu.memory_space<smem>>) -> (i32, i32) {
    %c0_i32 = arith.constant 0 : i32
    %c0_i32_0 = arith.constant 0 : i32
    return %arg0, %c0_i32 : i32, i32
  }
  func.func @transform_3(%arg0: i32, %arg1: memref<1xi32, #tpu.memory_space<smem>>, %arg2: memref<16xi32, #tpu.memory_space<smem>>) -> (i32, i32) {
    %c0_i32 = arith.constant 0 : i32
    %c0_i32_0 = arith.constant 0 : i32
    return %arg0, %c0_i32 : i32, i32
  }
}

module attributes {stable_mosaic.version = 11 : i64} {
  func.func @_logits_loss_kernel(%arg0: i32, %arg1: memref<1xi32, #tpu.memory_space<smem>>, %arg2: memref<16xi32, #tpu.memory_space<smem>>, %arg3: memref<16x1xi32, #tpu.memory_space<vmem>>, %arg4: memref<128x128xf32, #tpu.memory_space<vmem>>, %arg5: memref<16x128xf32, #tpu.memory_space<vmem>>, %arg6: memref<1x1xf32, #tpu.memory_space<vmem>>) attributes {dimension_semantics = [#tpu.dimension_semantics<parallel>], iteration_bounds = array<i64: 1>, scalar_prefetch = 2 : i64, scratch_operands = 0 : i64, tpu.core_type = #tpu.core_type<tc>, window_params = [{transform_indices = @transform_0, window_bounds = array<i64: 16, 1>}, {pipeline_mode = #tpu.pipeline_mode<synchronous>, transform_indices = @transform_1, window_bounds = array<i64: 128, 128>}, {transform_indices = @transform_2, window_bounds = array<i64: 16, 128>}, {transform_indices = @transform_3, window_bounds = array<i64: 1, 1>}]} {
    %c16_i32 = arith.constant 16 : i32
    %0 = arith.muli %arg0, %c16_i32 : i32
    %c0_i32 = arith.constant 0 : i32
    %c16_i32_0 = arith.constant 16 : i32
    %1 = arith.addi %c0_i32, %c16_i32_0 : i32
    %c1_i32 = arith.constant 1 : i32
    scf.for %arg7 = %c0_i32 to %1 step %c1_i32  : i32 {
      %35 = arith.addi %0, %arg7 : i32
      %36 = arith.index_cast %35 : i32 to index
      %37 = memref.load %arg2[%36] : memref<16xi32, #tpu.memory_space<smem>>
      %38 = arith.index_cast %37 : i32 to index
      %c0_13 = arith.constant 0 : index
      %39 = vector.load %arg4[%38, %c0_13] : memref<128x128xf32, #tpu.memory_space<vmem>>, vector<1x128xf32>
      %40 = arith.index_cast %arg7 : i32 to index
      %c0_14 = arith.constant 0 : index
      %41 = vector.load %arg5[%40, %c0_14] : memref<16x128xf32, #tpu.memory_space<vmem>>, vector<1x128xf32>
      tpu.vector_store %arg5[%40, %c0_14], %39 {strides = array<i32>} : memref<16x128xf32, #tpu.memory_space<vmem>>, vector<1x128xf32>,
    }
    %c16_i32_1 = arith.constant 16 : i32
    %c0 = arith.constant 0 : index
    %c0_2 = arith.constant 0 : index
    %2 = vector.load %arg5[%c0, %c0_2] : memref<16x128xf32, #tpu.memory_space<vmem>>, vector<16x128xf32>
    %c0_3 = arith.constant 0 : index
    %c0_4 = arith.constant 0 : index
    %3 = vector.load %arg3[%c0_3, %c0_4] : memref<16x1xi32, #tpu.memory_space<vmem>>, vector<16x1xi32>
    %c0_5 = arith.constant 0 : index
    %4 = memref.load %arg1[%c0_5] : memref<1xi32, #tpu.memory_space<smem>>
    %5 = tpu.iota {dimensions = array<i32: 1>} : vector<16x128xi32>
    %cst = arith.constant dense<0xFF800000> : vector<16xf32>
    %6 = vector.multi_reduction <maximumf>, %2, %cst [1] : vector<16x128xf32> to vector<16xf32>
    %7 = vector.shape_cast %6 : vector<16xf32> to vector<16x1xf32>
    %8 = vector.broadcast %7 : vector<16x1xf32> to vector<16x128xf32>
    %9 = arith.subf %2, %8 : vector<16x128xf32>
    %10 = math.exp %9 : vector<16x128xf32>
    %cst_6 = arith.constant dense<0.000000e+00> : vector<16xf32>
    %11 = vector.multi_reduction <add>, %10, %cst_6 [1] : vector<16x128xf32> to vector<16xf32>
    %12 = vector.shape_cast %11 : vector<16xf32> to vector<16x1xf32>
    %13 = math.log %12 : vector<16x1xf32>
    %14 = arith.addf %7, %13 : vector<16x1xf32>
    %15 = vector.broadcast %3 : vector<16x1xi32> to vector<16x128xi32>
    %16 = arith.cmpi eq, %5, %15 : vector<16x128xi32>
    %cst_7 = arith.constant 0.000000e+00 : f32
    %17 = vector.broadcast %cst_7 : f32 to vector<16x128xf32>
    %18 = arith.select %16, %2, %17 : vector<16x128xi1>, vector<16x128xf32>
    %cst_8 = arith.constant dense<0.000000e+00> : vector<16xf32>
    %19 = vector.multi_reduction <add>, %18, %cst_8 [1] : vector<16x128xf32> to vector<16xf32>
    %20 = vector.shape_cast %19 : vector<16xf32> to vector<16x1xf32>
    %21 = arith.subf %14, %20 : vector<16x1xf32>
    %22 = tpu.iota {dimensions = array<i32: 0>} : vector<16x1xi32>
    %23 = vector.broadcast %0 : i32 to vector<16x1xi32>
    %24 = arith.addi %23, %22 : vector<16x1xi32>
    %25 = vector.broadcast %4 : i32 to vector<16x1xi32>
    %26 = arith.cmpi slt, %24, %25 : vector<16x1xi32>
    %cst_9 = arith.constant 0.000000e+00 : f32
    %27 = vector.broadcast %cst_9 : f32 to vector<16x1xf32>
    %28 = arith.select %26, %21, %27 : vector<16x1xi1>, vector<16x1xf32>
    %29 = vector.shape_cast %28 : vector<16x1xf32> to vector<1x16x1xf32>
    %cst_10 = arith.constant dense<0.000000e+00> : vector<1xf32>
    %30 = vector.multi_reduction <add>, %29, %cst_10 [1, 2] : vector<1x16x1xf32> to vector<1xf32>
    %31 = vector.shape_cast %30 : vector<1xf32> to vector<1x1x1xf32>
    %32 = vector.extract %31[0, 0, 0] : f32 from vector<1x1x1xf32>
    %33 = vector.broadcast %32 : f32 to vector<1x1xf32>
    %c0_11 = arith.constant 0 : index
    %c0_12 = arith.constant 0 : index
    %34 = vector.load %arg6[%c0_11, %c0_12] : memref<1x1xf32, #tpu.memory_space<vmem>>, vector<1x1xf32>
    tpu.vector_store %arg6[%c0_11, %c0_12], %33 {strides = array<i32>} : memref<1x1xf32, #tpu.memory_space<vmem>>, vector<1x1xf32>,
    return
  }
  func.func @transform_0(%arg0: i32, %arg1: memref<1xi32, #tpu.memory_space<smem>>, %arg2: memref<16xi32, #tpu.memory_space<smem>>) -> (i32, i32) {
    %c0_i32 = arith.constant 0 : i32
    %c0_i32_0 = arith.constant 0 : i32
    return %arg0, %c0_i32 : i32, i32
  }
  func.func @transform_1(%arg0: i32, %arg1: memref<1xi32, #tpu.memory_space<smem>>, %arg2: memref<16xi32, #tpu.memory_space<smem>>) -> (i32, i32) {
    %c0_i32 = arith.constant 0 : i32
    %c0_i32_0 = arith.constant 0 : i32
    %c0_i32_1 = arith.constant 0 : i32
    return %c0_i32, %c0_i32_0 : i32, i32
  }
  func.func @transform_2(%arg0: i32, %arg1: memref<1xi32, #tpu.memory_space<smem>>, %arg2: memref<16xi32, #tpu.memory_space<smem>>) -> (i32, i32) {
    %c0_i32 = arith.constant 0 : i32
    %c0_i32_0 = arith.constant 0 : i32
    return %arg0, %c0_i32 : i32, i32
  }
  func.func @transform_3(%arg0: i32, %arg1: memref<1xi32, #tpu.memory_space<smem>>, %arg2: memref<16xi32, #tpu.memory_space<smem>>) -> (i32, i32) {
    %c0_i32 = arith.constant 0 : i32
    %c0_i32_0 = arith.constant 0 : i32
    return %arg0, %c0_i32 : i32, i32
  }
}

</mosaic_0001>

<bundles_post_ra>
// kernel: tpu_custom_call.1
= control target key start
LH: loop header
LB: loop body
LE: loop exit
PB: predicated region body
PF: predicated region fallthrough
CT: control target
= control target key end

     0   :  { %s371_s0 = inlined_call_operand.<no memory space> [shape: s32[1], index: 0, kind: input, shape index: {}]   ;;  %s372_s1 = inlined_call_operand.vmem [shape: s32[16], index: 1, kind: input, shape index: {}]   ;;  %s373_s2 = inlined_call_operand.vmem [shape: s32[16,1], index: 2, kind: input, shape index: {}]   ;;  %s374_s3 = inlined_call_operand.hbm [shape: f32[128,128], index: 3, kind: input, shape index: {}]   ;;  %s375_s4 = inlined_call_operand.hbm [shape: f32[16,128], index: 4, kind: output, shape index: {0}]   ;;  %s376_s5 = inlined_call_operand.hbm [shape: f32[1,1], index: 5, kind: output, shape index: {1}]  }
   0x1   :  { %11 = sst [smem:[#allocation3]] %s371_s0  ;;  %s12_s22 = sshll.u32 %s372_s1, 4  ;;  %s13_s22 = int_to_ptr.vmem [resolvable:$true] %s12_s22 }
   0x2   :  { %s186_s23 = scalar_lea.vmem %s13_s22, 16  ;;  %p191_p1 = scmp.lt.s32.totalorder %s13_s22, %s13_s22 }
   0x3   :  { %p187_p0 = scmp.ne.s32.totalorder %s13_s22, %s186_s23  ;;  %p192_p2 = scmp.lt.s32.totalorder %s186_s23, %s186_s23 }
   0x5   :  { %p193_p3 = por %p192_p2, %p191_p1 }
   0x7   :  { %p194_p4 = pnand %p193_p3, %p187_p0 }
   0x9   :  { %197 = shalt.err (!%p194_p4)  }
   0xa   :  { %s280_s24 = smov [#allocation4]  }
   0xb   :  { %15 = dma.vmem_to_smem %s13_s22, 16, %s280_s24, [#allocation2] }
   0xc   :  { %268 = dma.done.wait [#allocation2], 16 }
   0xd   :  { %269 = vsyncadd [#allocation2], 4294967280 }
   0xe   :  { %17 = sfence }
   0xf   :  { %18 = vsyncpa [#allocation6], 0 }
  0x10   :  { %19 = vsyncpa [#allocation7], 0 }
  0x11   :  { %20 = vsyncpa [#allocation10], 0  ;;  %s281_s0 = smov [#allocation5]   ;;  %s198_s27 = scalar_lea.hbm %s374_s3, 2048 }
  0x12   :  { %s28_s25 = sshll.u32 %s281_s0, 4  ;;  %p199_p5 = scmp.ne.s32.totalorder %s374_s3, %s198_s27  ;;  %s29_s25 = int_to_ptr.vmem [resolvable:$true] %s28_s25 }
  0x13   :  { %p202_p6 = scmp.lt.u32.totalorder %s198_s27, %s374_s3 }
  0x15   :  { %p204_p7 = pnand %p202_p6, %p199_p5 }
  0x17   :  { %207 = shalt.err (!%p204_p7)
}
  0x18   :  { %s208_s7 = scalar_lea.vmem %s29_s25, 2048  ;;  %p213_p9 = scmp.lt.s32.totalorder %s29_s25, %s29_s25 }
  0x19   :  { %p209_p8 = scmp.ne.s32.totalorder %s29_s25, %s208_s7  ;;  %p214_p10 = scmp.lt.s32.totalorder %s208_s7, %s208_s7 }
  0x1b   :  { %p215_p11 = por %p214_p10, %p213_p9 }
  0x1d   :  { %p216_p12 = pnand %p215_p11, %p209_p8 }
  0x1f   :  { %219 = shalt.err (!%p216_p12)
}
  0x20   :  { %s282_s8 = smov 128   ;;  %s283_s9 = smov 8  }
  0x21   :  { %34 = dma.hbm_to_vmem [thread:$0]  %s374_s3, 2048, %s29_s25, [#allocation6], %s282_s8, %s282_s8, %s283_s9  }
  0x22   :  { %270 = dma.done.wait [#allocation6], 2048  }
  0x23   :  { %271 = vsyncadd [#allocation6], 4294965248  ;;  %s276_s12 = smov 0  }
  0x24 LB: > { %s46_s13 = sld [smem:[#allocation4 + %s278_s12]]  ;;  %s49_s15 = scalar_lea.vmem [#allocation8], %s278_s12  ;;  %s278_s12 = sphi %s276_s12, %s44_s12  }
  0x25   : > { %s44_s12 = sadd.s32 1, %s278_s12  }
  0x26   : > { %p41_p13 = scmp.ge.s32.totalorder %s44_s12, 16  }
  0x27   :  { %v53_v2 = vld [vmem:[%s373_s2] sm:$0xff] (%p41_p13)  ;;  %v284_v3 = vmov (%p41_p13), 0   ;;  %v54_v5 = vld [vmem:[%s373_s2 + $0x8] sm:$0xff] (%p41_p13)  ;;  %v56_v11 = vlaneseq (%p41_p13)  ;;  %s55_s2 = sld [smem:[#allocation3]] (%p41_p13)  ;;  %vm105_vm4 = vcmask (%p41_p13), 7168   ;;  %s285_s19 = smov (%p41_p13), [#allocation8]  }
  0x28   :  { %43 = sbr.rel (!%p41_p13) target bundleno = 36 (0x24), region = 49  ;;  %176 = vset.pattern.permute.xlu1 (%p41_p13), %v284_v3  ;;  %177 = vset.pattern.permute.xlu0 (%p41_p13), %v284_v3  ;;  %s126_s20 = sshll.u32 (%p41_p13), %s285_s19, 4  ;;  %s127_s20 = int_to_ptr.vmem [resolvable:$true] %s126_s20 }
  0x29   :  { %79 = vperm.xlu1 (%p41_p13), %176, %v53_v2   ;;  %v57_v14 = vand.u32 (%p41_p13), 127, %v56_v11  ;;  %v95_v24 = vshrl.u32 (%p41_p13), %v56_v11, 7  ;;  %s220_s21 = scalar_lea.vmem (%p41_p13), %s127_s20, 256  ;;  %p225_p1 = scmp.lt.s32.totalorder (%p41_p13), %s127_s20, %s127_s20 }
  0x2a   : > { %s47_s14 = scalar_lea.vmem [#allocation5], %s46_s13  ;;  %p221_p0 = scmp.ne.s32.totalorder (%p41_p13), %s127_s20, %s220_s21 }
  0x2b   : > { %v48_v0 = vld [vmem:[%s47_s14] sm:$0x1]  ;;  %v96_v29 = vadd.s32 (%p41_p13), 8, %v95_v24  ;;  %p226_p2 = scmp.lt.s32.totalorder (%p41_p13), %s220_s21, %s220_s21 }
  0x2c   : > { %50 = vst [vmem:[%s49_s15] sm:$0x1] %v48_v0 }
  0x2d   :  { %82 = vperm.xlu1 (%p41_p13), %176, %v54_v5   ;;  %v100_v27 = vstv (%p41_p13), %s55_s2  ;;  %p227_p3 = por (%p41_p13), %p226_p2, %p225_p1 }
  0x2e   :  { %vm101_vm2 = vcmp.lt.s32.totalorder (%p41_p13), %v95_v24, %v100_v27  ;;  %vm102_vm3 = vcmp.lt.s32.totalorder (%p41_p13), %v96_v29, %v100_v27 }
  0x2f   :  { %p228_p4 = pnand %p227_p3, %p221_p0 }
  0x33   :  { %v51_v1 = vld [vmem:[#allocation8] sm:$0xff]  ;;  %v52_v4 = vld [vmem:[#allocation8 + $0x8] sm:$0xff] }
  0x34   :  { %58 = vmax.xlane.f32.xlu0 %v51_v1 }
  0x38   :  { %60 = vmax.xlane.f32.xlu0 %v52_v4 }
  0xa8   :  { %v80_v13 = vpop.permute.xlu1 %79 }
  0xa9   :  { %vm84_vm0 = vcmp.eq.s32.totalorder %v57_v14, %v80_v13 }
  0xaa   :  { %v86_v17 = vsel %vm84_vm0, %v51_v1, 0.0 }
  0xac   :  { %v83_v16 = vpop.permute.xlu1 %82 }
  0xad   :  { %vm85_vm1 = vcmp.eq.s32.totalorder %v57_v14, %v83_v16 }
  0xae   :  { %v87_v19 = vsel %vm85_vm1, %v52_v4, 0.0 }
  0xc1   :  { %v59_v6 = vpop.xlane.xlu0 %58 }
  0xc2   :  { %v62_v7 = vsub.f32 %v51_v1, %v59_v6 }
  0xc4   :  { %v64_v8 = vmul.f32 1.442695, %v62_v7 }
  0xc5   :  { %v61_v9 = vpop.xlane.xlu0 %60 }
  0xc6   :  { %178 = vpow2.f32 %v64_v8  ;;  %v63_v10 = vsub.f32 %v52_v4, %v61_v9 }
  0xc8   :  { %v66_v12 = vmul.f32 1.442695, %v63_v10 }
  0xca   :  { %180 = vpow2.f32 %v66_v12 }
  0xd0   :  { %v179_v15 = vpop.eup %178 }
  0xd1   :  { %68 = vadd.xlane.f32.xlu0 %v179_v15 }
  0xd4   :  { %v181_v18 = vpop.eup %180 }
  0xd5   :  { %70 = vadd.xlane.f32.xlu1 %v181_v18  ;;  %88 = vadd.xlane.f32.xlu0 %v86_v17 }
  0xd9   :  { %90 = vadd.xlane.f32.xlu0 %v87_v19 }
 0x15e   :  { %v69_v20 = vpop.xlane.xlu0 %68 }
 0x15f   :  { %182 = vlog2.f32 %v69_v20 }
 0x162   :  { %v71_v21 = vpop.xlane.xlu1 %70  ;;  %v89_v25 = vpop.xlane.xlu0 %88 }
 0x163   :  { %184 = vlog2.f32 %v71_v21 }
 0x166   :  { %v91_v33 = vpop.xlane.xlu0 %90 }
 0x169   :  { %v183_v22 = vpop.eup %182 }
 0x16a   :  { %v73_v23 = vmul.f32 0.6931472, %v183_v22 }
 0x16c   :  { %v76_v26 = vadd.f32 %v73_v23, %v59_v6 }
 0x16d   :  { %v185_v28 = vpop.eup %184 }
 0x16e   :  { %v75_v30 = vmul.f32 0.6931472, %v185_v28  ;;  %v92_v31 = vsub.f32 %v76_v26, %v89_v25 }
 0x170   :  { %v77_v32 = vadd.f32 %v75_v30, %v61_v9  ;;  %v103_v34 = vsel %vm101_vm2, %v92_v31, 0.0 }
 0x171   :  { %v106_v37 = vsel %vm105_vm4, %v103_v34, 0.0 }
 0x172   :  { %v93_v35 = vsub.f32 %v77_v32, %v91_v33 }
 0x174   :  { %v104_v36 = vsel %vm102_vm3, %v93_v35, 0.0 }
 0x175   :  { %v107_v38 = vsel %vm105_vm4, %v104_v36, 0.0 }
 0x176   :  { %v108_v39 = vadd.f32 %v107_v38, %v106_v37 }
 0x178   :  { %109 = vadd.xlane.f32.xlu0 %v108_v39 }
 0x179   :  { %231 = shalt.err (!%p228_p4)
}
 0x17a   :  { %s232_s24 = scalar_lea.hbm %s375_s4, 256 }
 0x17b   :  { %p233_p5 = scmp.ne.s32.totalorder %s375_s4, %s232_s24  ;;  %p236_p6 = scmp.lt.u32.totalorder %s232_s24, %s375_s4 }
 0x17d   :  { %p238_p7 = pnand %p236_p6, %p233_p5 }
 0x17f   :  { %241 = shalt.err (!%p238_p7)
}
 0x180   :  { %132 = dma.vmem_to_hbm [thread:$0]  %s127_s20, 256, %s375_s4, [#allocation7], %s282_s8, %s282_s8, %s283_s9   ;;  %vm119_vm5 = vcmask 0  }
 0x181   :  { %s286_s29 = smov [#allocation9]  }
 0x182   :  { %s139_s30 = sshll.u32 %s286_s29, 4  ;;  %s140_s30 = int_to_ptr.vmem [resolvable:$true] %s139_s30 }
 0x183   :  { %s242_s7 = scalar_lea.vmem %s140_s30, 16  ;;  %s246_s10 = scalar_lea.vmem %s140_s30, 32 }
 0x184   :  { %p243_p8 = scmp.ne.s32.totalorder %s140_s30, %s242_s7  ;;  %p247_p9 = scmp.lt.s32.totalorder %s140_s30, %s140_s30 }
 0x185   :  { %p248_p10 = scmp.lt.s32.totalorder %s246_s10, %s242_s7 }
 0x187   :  { %p249_p11 = por %p248_p10, %p247_p9 }
 0x189   :  { %p250_p12 = pnand %p249_p11, %p243_p8 }
 0x205   :  { %v110_v40 = vpop.xlane.xlu0 %109 }
 0x206   :  { %v111_v41 = vrot.slane %v110_v40, 4 }
 0x208   :  { %v112_v42 = vadd.f32 %v111_v41, %v110_v40 }
 0x20a   :  { %v113_v43 = vrot.slane %v112_v42, 2 }
 0x20c   :  { %v114_v44 = vadd.f32 %v113_v43, %v112_v42 }
 0x20e   :  { %v115_v45 = vrot.slane %v114_v44, 1 }
 0x210   :  { %v116_v46 = vadd.f32 %v115_v45, %v114_v44 }
 0x212   :  { %159 = vpush %v116_v46 }
 0x243   :  { %s160_s6 = spop %159 }
 0x244   :  { %v118_v47 = vstv %s160_s6 }
 0x245   :  { %120 = vst.msk [vmem:[#allocation9] sm:$0x1] %vm119_vm5, %v118_v47 }
 0x246   :  { %253 = shalt.err (!%p250_p12)
}
 0x247   :  { %s254_s9 = scalar_lea.hbm %s376_s5, 16 }
 0x248   :  { %p255_p13 = scmp.ne.s32.totalorder %s376_s5, %s254_s9  ;;  %p258_p0 = scmp.lt.u32.totalorder %s254_s9, %s376_s5 }
 0x24a   :  { %p260_p1 = pnand %p258_p0, %p255_p13 }
 0x24c   :  { %263 = shalt.err (!%p260_p1)
}
 0x24d   :  { %142 = dma.vmem_to_hbm [thread:$0]  %s140_s30, 16, %s376_s5, [#allocation10]  }
 0x24e   :  { %272 = dma.done.wait [#allocation7], 256  }
 0x24f   :  { %273 = vsyncadd [#allocation7], 4294967040 }
 0x250   :  { %274 = dma.done.wait [#allocation10], 16  }
 0x251   :  { %275 = vsyncadd [#allocation10], 4294967280 }
 0x252   :  { %149 = vsyncpa [#allocation6], 1 }
 0x253   :  { %150 = vsyncpa [#allocation7], 1 }
 0x254   :  { %151 = vsyncpa [#allocation10], 1 }

// kernel: tpu_custom_call.1
= control target key start
LH: loop header
LB: loop body
LE: loop exit
PB: predicated region body
PF: predicated region fallthrough
CT: control target
= control target key end

     0   :  { %s371_s0 = inlined_call_operand.<no memory space> [shape: s32[1], index: 0, kind: input, shape index: {}]   ;;  %s372_s1 = inlined_call_operand.vmem [shape: s32[16], index: 1, kind: input, shape index: {}]   ;;  %s373_s2 = inlined_call_operand.vmem [shape: s32[16,1], index: 2, kind: input, shape index: {}]   ;;  %s374_s3 = inlined_call_operand.hbm [shape: f32[128,128], index: 3, kind: input, shape index: {}]   ;;  %s375_s4 = inlined_call_operand.hbm [shape: f32[16,128], index: 4, kind: output, shape index: {0}]   ;;  %s376_s5 = inlined_call_operand.hbm [shape: f32[1,1], index: 5, kind: output, shape index: {1}]  }
   0x1   :  { %11 = sst [smem:[#allocation3]] %s371_s0  ;;  %s12_s22 = sshll.u32 %s372_s1, 4  ;;  %s13_s22 = int_to_ptr.vmem [resolvable:$true] %s12_s22 }
   0x2   :  { %s186_s23 = scalar_lea.vmem %s13_s22, 16  ;;  %p191_p1 = scmp.lt.s32.totalorder %s13_s22, %s13_s22 }
   0x3   :  { %p187_p0 = scmp.ne.s32.totalorder %s13_s22, %s186_s23  ;;  %p192_p2 = scmp.lt.s32.totalorder %s186_s23, %s186_s23 }
   0x5   :  { %p193_p3 = por %p192_p2, %p191_p1 }
   0x7   :  { %p194_p4 = pnand %p193_p3, %p187_p0 }
   0x9   :  { %197 = shalt.err (!%p194_p4)  }
   0xa   :  { %s280_s24 = smov [#allocation4]  }
   0xb   :  { %15 = dma.vmem_to_smem %s13_s22, 16, %s280_s24, [#allocation2] }
   0xc   :  { %268 = dma.done.wait [#allocation2], 16 }
   0xd   :  { %269 = vsyncadd [#allocation2], 4294967280 }
   0xe   :  { %17 = sfence }
   0xf   :  { %18 = vsyncpa [#allocation6], 0 }
  0x10   :  { %19 = vsyncpa [#allocation7], 0 }
  0x11   :  { %20 = vsyncpa [#allocation10], 0  ;;  %s281_s0 = smov [#allocation5]   ;;  %s198_s27 = scalar_lea.hbm %s374_s3, 2048 }
  0x12   :  { %s28_s25 = sshll.u32 %s281_s0, 4  ;;  %p199_p5 = scmp.ne.s32.totalorder %s374_s3, %s198_s27  ;;  %s29_s25 = int_to_ptr.vmem [resolvable:$true] %s28_s25 }
  0x13   :  { %p202_p6 = scmp.lt.u32.totalorder %s198_s27, %s374_s3 }
  0x15   :  { %p204_p7 = pnand %p202_p6, %p199_p5 }
  0x17   :  { %207 = shalt.err (!%p204_p7)
}
  0x18   :  { %s208_s7 = scalar_lea.vmem %s29_s25, 2048  ;;  %p213_p9 = scmp.lt.s32.totalorder %s29_s25, %s29_s25 }
  0x19   :  { %p209_p8 = scmp.ne.s32.totalorder %s29_s25, %s208_s7  ;;  %p214_p10 = scmp.lt.s32.totalorder %s208_s7, %s208_s7 }
  0x1b   :  { %p215_p11 = por %p214_p10, %p213_p9 }
  0x1d   :  { %p216_p12 = pnand %p215_p11, %p209_p8 }
  0x1f   :  { %219 = shalt.err (!%p216_p12)
}
  0x20   :  { %s282_s8 = smov 128   ;;  %s283_s9 = smov 8  }
  0x21   :  { %34 = dma.hbm_to_vmem [thread:$0]  %s374_s3, 2048, %s29_s25, [#allocation6], %s282_s8, %s282_s8, %s283_s9  }
  0x22   :  { %270 = dma.done.wait [#allocation6], 2048  }
  0x23   :  { %271 = vsyncadd [#allocation6], 4294965248  ;;  %s276_s12 = smov 0  }
  0x24 LB: > { %s46_s13 = sld [smem:[#allocation4 + %s278_s12]]  ;;  %s49_s15 = scalar_lea.vmem [#allocation8], %s278_s12  ;;  %s278_s12 = sphi %s276_s12, %s44_s12  }
  0x25   : > { %s44_s12 = sadd.s32 1, %s278_s12  }
  0x26   : > { %p41_p13 = scmp.ge.s32.totalorder %s44_s12, 16  }
  0x27   :  { %v53_v2 = vld [vmem:[%s373_s2] sm:$0xff] (%p41_p13)  ;;  %v284_v3 = vmov (%p41_p13), 0   ;;  %v54_v5 = vld [vmem:[%s373_s2 + $0x8] sm:$0xff] (%p41_p13)  ;;  %v56_v11 = vlaneseq (%p41_p13)  ;;  %s55_s2 = sld [smem:[#allocation3]] (%p41_p13)  ;;  %vm105_vm4 = vcmask (%p41_p13), 7168   ;;  %s285_s19 = smov (%p41_p13), [#allocation8]  }
  0x28   :  { %43 = sbr.rel (!%p41_p13) target bundleno = 36 (0x24), region = 49  ;;  %176 = vset.pattern.permute.xlu1 (%p41_p13), %v284_v3  ;;  %177 = vset.pattern.permute.xlu0 (%p41_p13), %v284_v3  ;;  %s126_s20 = sshll.u32 (%p41_p13), %s285_s19, 4  ;;  %s127_s20 = int_to_ptr.vmem [resolvable:$true] %s126_s20 }
  0x29   :  { %79 = vperm.xlu1 (%p41_p13), %176, %v53_v2   ;;  %v57_v14 = vand.u32 (%p41_p13), 127, %v56_v11  ;;  %v95_v24 = vshrl.u32 (%p41_p13), %v56_v11, 7  ;;  %s220_s21 = scalar_lea.vmem (%p41_p13), %s127_s20, 256  ;;  %p225_p1 = scmp.lt.s32.totalorder (%p41_p13), %s127_s20, %s127_s20 }
  0x2a   : > { %s47_s14 = scalar_lea.vmem [#allocation5], %s46_s13  ;;  %p221_p0 = scmp.ne.s32.totalorder (%p41_p13), %s127_s20, %s220_s21 }
  0x2b   : > { %v48_v0 = vld [vmem:[%s47_s14] sm:$0x1]  ;;  %v96_v29 = vadd.s32 (%p41_p13), 8, %v95_v24  ;;  %p226_p2 = scmp.lt.s32.totalorder (%p41_p13), %s220_s21, %s220_s21 }
  0x2c   : > { %50 = vst [vmem:[%s49_s15] sm:$0x1] %v48_v0 }
  0x2d   :  { %82 = vperm.xlu1 (%p41_p13), %176, %v54_v5   ;;  %v100_v27 = vstv (%p41_p13), %s55_s2  ;;  %p227_p3 = por (%p41_p13), %p226_p2, %p225_p1 }
  0x2e   :  { %vm101_vm2 = vcmp.lt.s32.totalorder (%p41_p13), %v95_v24, %v100_v27  ;;  %vm102_vm3 = vcmp.lt.s32.totalorder (%p41_p13), %v96_v29, %v100_v27 }
  0x2f   :  { %p228_p4 = pnand %p227_p3, %p221_p0 }
  0x33   :  { %v51_v1 = vld [vmem:[#allocation8] sm:$0xff]  ;;  %v52_v4 = vld [vmem:[#allocation8 + $0x8] sm:$0xff] }
  0x34   :  { %58 = vmax.xlane.f32.xlu0 %v51_v1 }
  0x38   :  { %60 = vmax.xlane.f32.xlu0 %v52_v4 }
  0xa8   :  { %v80_v13 = vpop.permute.xlu1 %79 }
  0xa9   :  { %vm84_vm0 = vcmp.eq.s32.totalorder %v57_v14, %v80_v13 }
  0xaa   :  { %v86_v17 = vsel %vm84_vm0, %v51_v1, 0.0 }
  0xac   :  { %v83_v16 = vpop.permute.xlu1 %82 }
  0xad   :  { %vm85_vm1 = vcmp.eq.s32.totalorder %v57_v14, %v83_v16 }
  0xae   :  { %v87_v19 = vsel %vm85_vm1, %v52_v4, 0.0 }
  0xc1   :  { %v59_v6 = vpop.xlane.xlu0 %58 }
  0xc2   :  { %v62_v7 = vsub.f32 %v51_v1, %v59_v6 }
  0xc4   :  { %v64_v8 = vmul.f32 1.442695, %v62_v7 }
  0xc5   :  { %v61_v9 = vpop.xlane.xlu0 %60 }
  0xc6   :  { %178 = vpow2.f32 %v64_v8  ;;  %v63_v10 = vsub.f32 %v52_v4, %v61_v9 }
  0xc8   :  { %v66_v12 = vmul.f32 1.442695, %v63_v10 }
  0xca   :  { %180 = vpow2.f32 %v66_v12 }
  0xd0   :  { %v179_v15 = vpop.eup %178 }
  0xd1   :  { %68 = vadd.xlane.f32.xlu0 %v179_v15 }
  0xd4   :  { %v181_v18 = vpop.eup %180 }
  0xd5   :  { %70 = vadd.xlane.f32.xlu1 %v181_v18  ;;  %88 = vadd.xlane.f32.xlu0 %v86_v17 }
  0xd9   :  { %90 = vadd.xlane.f32.xlu0 %v87_v19 }
 0x15e   :  { %v69_v20 = vpop.xlane.xlu0 %68 }
 0x15f   :  { %182 = vlog2.f32 %v69_v20 }
 0x162   :  { %v71_v21 = vpop.xlane.xlu1 %70  ;;  %v89_v25 = vpop.xlane.xlu0 %88 }
 0x163   :  { %184 = vlog2.f32 %v71_v21 }
 0x166   :  { %v91_v33 = vpop.xlane.xlu0 %90 }
 0x169   :  { %v183_v22 = vpop.eup %182 }
 0x16a   :  { %v73_v23 = vmul.f32 0.6931472, %v183_v22 }
 0x16c   :  { %v76_v26 = vadd.f32 %v73_v23, %v59_v6 }
 0x16d   :  { %v185_v28 = vpop.eup %184 }
 0x16e   :  { %v75_v30 = vmul.f32 0.6931472, %v185_v28  ;;  %v92_v31 = vsub.f32 %v76_v26, %v89_v25 }
 0x170   :  { %v77_v32 = vadd.f32 %v75_v30, %v61_v9  ;;  %v103_v34 = vsel %vm101_vm2, %v92_v31, 0.0 }
 0x171   :  { %v106_v37 = vsel %vm105_vm4, %v103_v34, 0.0 }
 0x172   :  { %v93_v35 = vsub.f32 %v77_v32, %v91_v33 }
 0x174   :  { %v104_v36 = vsel %vm102_vm3, %v93_v35, 0.0 }
 0x175   :  { %v107_v38 = vsel %vm105_vm4, %v104_v36, 0.0 }
 0x176   :  { %v108_v39 = vadd.f32 %v107_v38, %v106_v37 }
 0x178   :  { %109 = vadd.xlane.f32.xlu0 %v108_v39 }
 0x179   :  { %231 = shalt.err (!%p228_p4)
}
 0x17a   :  { %s232_s24 = scalar_lea.hbm %s375_s4, 256 }
 0x17b   :  { %p233_p5 = scmp.ne.s32.totalorder %s375_s4, %s232_s24  ;;  %p236_p6 = scmp.lt.u32.totalorder %s232_s24, %s375_s4 }
 0x17d   :  { %p238_p7 = pnand %p236_p6, %p233_p5 }
 0x17f   :  { %241 = shalt.err (!%p238_p7)
}
 0x180   :  { %132 = dma.vmem_to_hbm [thread:$0]  %s127_s20, 256, %s375_s4, [#allocation7], %s282_s8, %s282_s8, %s283_s9   ;;  %vm119_vm5 = vcmask 0  }
 0x181   :  { %s286_s29 = smov [#allocation9]  }
 0x182   :  { %s139_s30 = sshll.u32 %s286_s29, 4  ;;  %s140_s30 = int_to_ptr.vmem [resolvable:$true] %s139_s30 }
 0x183   :  { %s242_s7 = scalar_lea.vmem %s140_s30, 16  ;;  %s246_s10 = scalar_lea.vmem %s140_s30, 32 }
 0x184   :  { %p243_p8 = scmp.ne.s32.totalorder %s140_s30, %s242_s7  ;;  %p247_p9 = scmp.lt.s32.totalorder %s140_s30, %s140_s30 }
 0x185   :  { %p248_p10 = scmp.lt.s32.totalorder %s246_s10, %s242_s7 }
 0x187   :  { %p249_p11 = por %p248_p10, %p247_p9 }
 0x189   :  { %p250_p12 = pnand %p249_p11, %p243_p8 }
 0x205   :  { %v110_v40 = vpop.xlane.xlu0 %109 }
 0x206   :  { %v111_v41 = vrot.slane %v110_v40, 4 }
 0x208   :  { %v112_v42 = vadd.f32 %v111_v41, %v110_v40 }
 0x20a   :  { %v113_v43 = vrot.slane %v112_v42, 2 }
 0x20c   :  { %v114_v44 = vadd.f32 %v113_v43, %v112_v42 }
 0x20e   :  { %v115_v45 = vrot.slane %v114_v44, 1 }
 0x210   :  { %v116_v46 = vadd.f32 %v115_v45, %v114_v44 }
 0x212   :  { %159 = vpush %v116_v46 }
 0x243   :  { %s160_s6 = spop %159 }
 0x244   :  { %v118_v47 = vstv %s160_s6 }
 0x245   :  { %120 = vst.msk [vmem:[#allocation9] sm:$0x1] %vm119_vm5, %v118_v47 }
 0x246   :  { %253 = shalt.err (!%p250_p12)
}
 0x247   :  { %s254_s9 = scalar_lea.hbm %s376_s5, 16 }
 0x248   :  { %p255_p13 = scmp.ne.s32.totalorder %s376_s5, %s254_s9  ;;  %p258_p0 = scmp.lt.u32.totalorder %s254_s9, %s376_s5 }
 0x24a   :  { %p260_p1 = pnand %p258_p0, %p255_p13 }
 0x24c   :  { %263 = shalt.err (!%p260_p1)
}
 0x24d   :  { %142 = dma.vmem_to_hbm [thread:$0]  %s140_s30, 16, %s376_s5, [#allocation10]  }
 0x24e   :  { %272 = dma.done.wait [#allocation7], 256  }
 0x24f   :  { %273 = vsyncadd [#allocation7], 4294967040 }
 0x250   :  { %274 = dma.done.wait [#allocation10], 16  }
 0x251   :  { %275 = vsyncadd [#allocation10], 4294967280 }
 0x252   :  { %149 = vsyncpa [#allocation6], 1 }
 0x253   :  { %150 = vsyncpa [#allocation7], 1 }
 0x254   :  { %151 = vsyncpa [#allocation10], 1 }

</bundles_post_ra>
